<compile_context>
chip_gen: v6e
topology: v6e:2x2x1
jax: 0.10.0
libtpu: 0.0.40
codegen_flags: <defaults>
</compile_context>

<pallas_src>
import functools

import jax
import jax.numpy as jnp
from jax.experimental import pallas as pl
from jax.experimental.pallas import tpu as pltpu

NUM_CLASSES = 5
C_PAD = 128                    # lane-dense padded class dimension (exactly one vreg width)
_NEG_BIG = -1e30               # finite "-inf" for padded class columns (f32 math only)


def _round_up(n, m):
    return ((n + m - 1) // m) * m


def _vmem_limit_bytes():
    # ~half of physical VMEM: 64 MiB on v5e/v6e (128 MiB), 32 MiB on v7x (64 MiB).
    try:
        cap = pltpu.get_tpu_info().vmem_capacity_bytes
        return max(32 * 1024 * 1024, min(64 * 1024 * 1024, cap // 2))
    except Exception:
        return 32 * 1024 * 1024


def _choose_tile_b(batch, d, itemsize, max_rows):
    # Sublane pack per dtype: f32 -> 8, bf16 -> 16, int8/fp8 -> 32.
    pack = max(8, 32 // max(1, itemsize))
    budget = 4 * 1024 * 1024                       # ~4 MiB x tile per grid step
    tile = budget // max(1, d * itemsize)
    tile = min(max(tile, pack), max_rows)
    tile = max(pack, (tile // pack) * pack)
    return min(tile, _round_up(batch, pack))


def _pad_params(w, b, mxu_dtype):
    d = w.shape[0]
    w_pad = jnp.zeros((d, C_PAD), w.dtype).at[:, :NUM_CLASSES].set(w)
    if mxu_dtype is not None:
        w_pad = w_pad.astype(mxu_dtype)            # halves W HBM traffic / feeds MXU bf16
    b_pad = jnp.full((1, C_PAD), _NEG_BIG, jnp.float32)
    b_pad = b_pad.at[0, :NUM_CLASSES].set(b.astype(jnp.float32))
    return w_pad, b_pad


def _matmul_logits(x_ref, w_ref, b_ref, mxu_dtype):
    x = x_ref[...]
    w = w_ref[...]
    if mxu_dtype is not None:
        x = x.astype(mxu_dtype)
        w = w.astype(mxu_dtype)
    # TODO(synk): if D grows into the tens of thousands, add a K-tiled grid axis
    # with an f32 accumulator and pipeline_mode=pl.Buffered(1) on the constant
    # W/bias blocks instead of pulling the full (TILE_B, D) strip + W at once.
    return jnp.dot(x, w, preferred_element_type=jnp.float32) + b_ref[...]


def _linear_kernel(x_ref, w_ref, b_ref, o_ref, *, mxu_dtype):
    logits = _matmul_logits(x_ref, w_ref, b_ref, mxu_dtype)       # (tile_b, C_PAD) f32
    o_ref[...] = logits[:, :NUM_CLASSES].astype(o_ref.dtype)      # narrow, masked vst


def _ce_loss_kernel(x_ref, w_ref, b_ref, y_ref, part_ref, *, total_b, tile_b, mxu_dtype):
    pid = pl.program_id(0)
    logits = _matmul_logits(x_ref, w_ref, b_ref, mxu_dtype)       # (tile_b, C_PAD) f32

    # Mask rows that only exist because of the ragged last tile BEFORE max/exp,
    # so unspecified data in the padding region cannot poison the sum with NaN.
    row_ids = pid * tile_b + jax.lax.broadcasted_iota(jnp.int32, (tile_b, 1), 0)
    valid = row_ids < total_b                                     # (tile_b, 1) bool
    logits = jnp.where(valid, logits, 0.0)

    # Numerically stable log-sum-exp over classes (padded columns sit at ~-1e30).
    m = jnp.max(logits, axis=-1, keepdims=True)
    lse = jnp.log(jnp.sum(jnp.exp(logits - m), axis=-1, keepdims=True)) + m

    # Pick logits[i, y[i]] via one-hot over the class axis.
    class_ids = jax.lax.broadcasted_iota(jnp.int32, logits.shape, 1)
    onehot = (class_ids == y_ref[...]).astype(jnp.float32)        # (tile_b, C_PAD)
    picked = jnp.sum(onehot * logits, axis=-1, keepdims=True)     # (tile_b, 1)

    partial = jnp.sum((lse - picked) * valid.astype(jnp.float32))
    # Per-tile partial sum into this step's own lane-dense block -> batch axis
    # can be "parallel" (megacore); wrapper reduces across tiles.
    part_ref[...] = jnp.zeros_like(part_ref) + partial


def torch_model_forward(x, w, b, y=None, *, mxu_dtype=None):
    """Mirrors TorchModel.forward: returns logits if y is None, else mean CE loss.

    mxu_dtype: optionally cast x/W tiles (e.g. jnp.bfloat16) before the MXU dot;
    accumulation stays f32.  Leave None for bit-exact f32 linear output.
    """
    batch, d = x.shape
    vmem_limit = _vmem_limit_bytes()
    w_padded, bias_padded = _pad_params(w, b, mxu_dtype)

    if y is None:
        tile_b = _choose_tile_b(batch, d, x.dtype.itemsize, max_rows=8192)
        grid = (pl.cdiv(batch, tile_b),)
        return pl.pallas_call(
            functools.partial(_linear_kernel, mxu_dtype=mxu_dtype),
            out_shape=jax.ShapeDtypeStruct((batch, NUM_CLASSES), x.dtype),
            grid_spec=pltpu.PrefetchScalarGridSpec(
                num_scalar_prefetch=0,
                grid=grid,
                in_specs=[
                    pl.BlockSpec((tile_b, d), lambda i: (i, 0)),
                    pl.BlockSpec((d, C_PAD), lambda i: (0, 0)),
                    pl.BlockSpec((1, C_PAD), lambda i: (0, 0)),
                ],
                out_specs=pl.BlockSpec((tile_b, NUM_CLASSES), lambda i: (i, 0)),
            ),
            compiler_params=pltpu.CompilerParams(
                dimension_semantics=("parallel",),
                vmem_limit_bytes=vmem_limit,
            ),
        )(x, w_padded, bias_padded)

    # CE path: smaller row cap because the (tile_b, 128) f32 temporaries dominate VMEM.
    tile_b = _choose_tile_b(batch, d, x.dtype.itemsize, max_rows=4096)
    grid = (pl.cdiv(batch, tile_b),)
    num_tiles = grid[0]
    y2 = y.astype(jnp.int32).reshape(batch, 1)

    kernel = functools.partial(_ce_loss_kernel, total_b=batch, tile_b=tile_b,
                               mxu_dtype=mxu_dtype)
    partials = pl.pallas_call(
        kernel,
        out_shape=jax.ShapeDtypeStruct((num_tiles, 1, C_PAD), jnp.float32),
        grid_spec=pltpu.PrefetchScalarGridSpec(
            num_scalar_prefetch=0,
            grid=grid,
            in_specs=[
                pl.BlockSpec((tile_b, d), lambda i: (i, 0)),
                pl.BlockSpec((d, C_PAD), lambda i: (0, 0)),
                pl.BlockSpec((1, C_PAD), lambda i: (0, 0)),
                pl.BlockSpec((tile_b, 1), lambda i: (i, 0)),
            ],
            out_specs=pl.BlockSpec((1, 1, C_PAD), lambda i: (i, 0, 0)),
        ),
        compiler_params=pltpu.CompilerParams(
            dimension_semantics=("parallel",),
            vmem_limit_bytes=vmem_limit,
        ),
    )(x, w_padded, bias_padded, y2)
    # Cross-tile reduction (tiny) done in the wrapper -> enables megacore + better accuracy.
    return jnp.sum(partials[:, 0, 0]) / batch


if __name__ == "__main__":
    # Small shapes consistent with the module: batch=8, input_size=32, classes=5.
    B, D = 8, 32
    key = jax.random.PRNGKey(0)
    kx, kw, kb, ky = jax.random.split(key, 4)

    x = jax.random.normal(kx, (B, D), dtype=jnp.float32)
    # PyTorch Linear stores weight (5, D) + bias (5,); we use the (D, 5) layout directly.
    w = jax.random.normal(kw, (D, NUM_CLASSES), dtype=jnp.float32) * 0.1
    b = jax.random.normal(kb, (NUM_CLASSES,), dtype=jnp.float32) * 0.1
    y = jax.random.randint(ky, (B,), 0, NUM_CLASSES, dtype=jnp.int32)

    # Inference path: logits
    logits = jax.block_until_ready(torch_model_forward(x, w, b))
    # Training path: scalar mean cross-entropy loss
    loss = jax.block_until_ready(torch_model_forward(x, w, b, y))
    # v5e-oriented bf16-fed MXU variant (f32 accumulation), loose tolerance.
    logits_bf16 = jax.block_until_ready(
        torch_model_forward(x, w, b, mxu_dtype=jnp.bfloat16))

    # Pure-JAX reference
    ref_logits = x @ w + b
    ref_lse = jax.nn.logsumexp(ref_logits, axis=-1)
    ref_loss = jnp.mean(ref_lse - ref_logits[jnp.arange(B), y])
    assert jnp.allclose(logits, ref_logits, atol=1e-5, rtol=1e-5)
    assert jnp.allclose(loss, ref_loss, atol=1e-5, rtol=1e-5)
    assert jnp.allclose(logits_bf16, ref_logits, atol=5e-2, rtol=5e-2)

    print("KERNEL_OK")
</pallas_src>

<mosaic_0001>
module attributes {stable_mosaic.version = 11 : i64} {
  func.func @_linear_kernel(%arg0: i32, %arg1: memref<8x32xf32, #tpu.memory_space<vmem>>, %arg2: memref<32x128xf32, #tpu.memory_space<vmem>>, %arg3: memref<1x128xf32, #tpu.memory_space<vmem>>, %arg4: memref<8x5xf32, #tpu.memory_space<vmem>>) attributes {dimension_semantics = [#tpu.dimension_semantics<parallel>], iteration_bounds = array<i64: 1>, scalar_prefetch = 0 : i64, scratch_operands = 0 : i64, tpu.core_type = #tpu.core_type<tc>, window_params = [{transform_indices = @transform_0, window_bounds = array<i64: 8, 32>}, {pipeline_mode = #tpu.pipeline_mode<synchronous>, transform_indices = @transform_1, window_bounds = array<i64: 32, 128>}, {pipeline_mode = #tpu.pipeline_mode<synchronous>, transform_indices = @transform_2, window_bounds = array<i64: 1, 128>}, {transform_indices = @transform_3, window_bounds = array<i64: 8, 5>}]} {
    %c0 = arith.constant 0 : index
    %c0_0 = arith.constant 0 : index
    %0 = vector.load %arg1[%c0, %c0_0] : memref<8x32xf32, #tpu.memory_space<vmem>>, vector<8x32xf32>
    %c0_1 = arith.constant 0 : index
    %c0_2 = arith.constant 0 : index
    %1 = vector.load %arg2[%c0_1, %c0_2] : memref<32x128xf32, #tpu.memory_space<vmem>>, vector<32x128xf32>
    %cst = arith.constant dense<0.000000e+00> : vector<8x128xf32>
    %2 = tpu.matmul %0, %1, %cst {dimension_numbers = #tpu.dot_dimension_numbers<[1], [0], [0], [1], [0, 0, 1, 1], [], []>} : vector<8x32xf32>, vector<32x128xf32>, vector<8x128xf32> -> vector<8x128xf32>
    %c0_3 = arith.constant 0 : index
    %c0_4 = arith.constant 0 : index
    %3 = vector.load %arg3[%c0_3, %c0_4] : memref<1x128xf32, #tpu.memory_space<vmem>>, vector<1x128xf32>
    %4 = vector.broadcast %3 : vector<1x128xf32> to vector<8x128xf32>
    %5 = arith.addf %2, %4 : vector<8x128xf32>
    %6 = vector.extract_strided_slice %5 {offsets = [0, 0], sizes = [8, 5], strides = [1, 1]} : vector<8x128xf32> to vector<8x5xf32>
    %c0_5 = arith.constant 0 : index
    %c0_6 = arith.constant 0 : index
    %7 = vector.load %arg4[%c0_5, %c0_6] : memref<8x5xf32, #tpu.memory_space<vmem>>, vector<8x5xf32>
    tpu.vector_store %arg4[%c0_5, %c0_6], %6 {strides = array<i32>} : memref<8x5xf32, #tpu.memory_space<vmem>>, vector<8x5xf32>,
    return
  }
  func.func @transform_0(%arg0: i32) -> (i32, i32) {
    %c0_i32 = arith.constant 0 : i32
    %c0_i32_0 = arith.constant 0 : i32
    return %arg0, %c0_i32 : i32, i32
  }
  func.func @transform_1(%arg0: i32) -> (i32, i32) {
    %c0_i32 = arith.constant 0 : i32
    %c0_i32_0 = arith.constant 0 : i32
    %c0_i32_1 = arith.constant 0 : i32
    return %c0_i32, %c0_i32_0 : i32, i32
  }
  func.func @transform_2(%arg0: i32) -> (i32, i32) {
    %c0_i32 = arith.constant 0 : i32
    %c0_i32_0 = arith.constant 0 : i32
    %c0_i32_1 = arith.constant 0 : i32
    return %c0_i32, %c0_i32_0 : i32, i32
  }
  func.func @transform_3(%arg0: i32) -> (i32, i32) {
    %c0_i32 = arith.constant 0 : i32
    %c0_i32_0 = arith.constant 0 : i32
    return %arg0, %c0_i32 : i32, i32
  }
}

</mosaic_0001>

<bundles_post_ra>
// kernel: tpu_custom_call.1
= control target key start
LH: loop header
LB: loop body
LE: loop exit
PB: predicated region body
PF: predicated region fallthrough
CT: control target
= control target key end

     0   :  { %8 = vsyncpa [#allocation3], 0  ;;  %s275_s0 = inlined_call_operand.hbm [shape: f32[8,32], index: 0, kind: input, shape index: {}]   ;;  %s276_s1 = inlined_call_operand.hbm [shape: f32[32,128], index: 1, kind: input, shape index: {}]   ;;  %s277_s2 = inlined_call_operand.vmem [shape: f32[1,128], index: 2, kind: input, shape index: {}]   ;;  %s278_s3 = inlined_call_operand.hbm [shape: f32[8,5], index: 3, kind: output, shape index: {}]  }
   0x1   :  { %9 = vsyncpa [#allocation6], 0 }
   0x2   :  { %10 = vsyncpa [#allocation4], 0  ;;  %s236_s12 = smov [#allocation2]   ;;  %s237_s14 = smov [#allocation5]  }
   0x3   :  { %s17_s13 = sshll.u32 %s236_s12, 4  ;;  %s26_s15 = sshll.u32 %s237_s14, 4  ;;  %s18_s13 = int_to_ptr.vmem [resolvable:$true] %s17_s13  ;;  %s27_s15 = int_to_ptr.vmem [resolvable:$true] %s26_s15 }
   0x4   :  { %s178_s16 = scalar_lea.vmem %s18_s13, 128  ;;  %p183_p1 = scmp.lt.s32.totalorder %s18_s13, %s18_s13 }
   0x5   :  { %p179_p0 = scmp.ne.s32.totalorder %s18_s13, %s178_s16  ;;  %p184_p2 = scmp.lt.s32.totalorder %s178_s16, %s178_s16 }
   0x7   :  { %p185_p3 = por %p184_p2, %p183_p1 }
   0x9   :  { %p186_p4 = pnand %p185_p3, %p179_p0 }
   0xb   :  { %189 = shalt.err (!%p186_p4)
}
   0xc   :  { %20 = dma.hbm_to_vmem [thread:$0]  %s275_s0, 128, %s18_s13, [#allocation3]  }
   0xd   :  { %s198_s19 = scalar_lea.vmem %s27_s15, 512  ;;  %p203_p6 = scmp.lt.s32.totalorder %s27_s15, %s27_s15 }
   0xe   :  { %p199_p5 = scmp.ne.s32.totalorder %s27_s15, %s198_s19  ;;  %p204_p7 = scmp.lt.s32.totalorder %s198_s19, %s198_s19 }
  0x10   :  { %p205_p8 = por %p204_p7, %p203_p6 }
  0x12   :  { %p206_p9 = pnand %p205_p8, %p199_p5 }
  0x14   :  { %209 = shalt.err (!%p206_p9)
}
  0x15   :  { %s238_s20 = smov 128   ;;  %s239_s21 = smov 8  }
  0x16   :  { %32 = dma.hbm_to_vmem [thread:$0]  %s276_s1, 512, %s27_s15, [#allocation6], %s238_s20, %s238_s20, %s239_s21  }
  0x17   :  { %230 = dma.done.wait [#allocation3], 128  }
  0x18   :  { %231 = vsyncadd [#allocation3], 4294967168 }
  0x19   :  { %232 = dma.done.wait [#allocation6], 512  }
  0x1a   :  { %233 = vsyncadd [#allocation6], 4294966784  ;;  %v240_v0 = vmov 0.0   ;;  %vm241_vm0 = vmmov 0   ;;  %v45_v1 = vld [vmem:[#allocation5 + $0x18] sm:$0xff]  ;;  %v44_v2 = vld [vmem:[#allocation5 + $0x10] sm:$0xff] }
  0x1b   :  { %152 = vmatprep.subr.mxu0 %v240_v0  ;;  %160 = vmatprep.mubr.msk.f32.mxu0 %vm241_vm0, %v240_v0  ;;  %v43_v3 = vld [vmem:[#allocation5 + $0x8] sm:$0xff]  ;;  %v42_v4 = vld [vmem:[#allocation5] sm:$0xff]  ;;  %v41_v5 = vld [vmem:[#allocation2] sm:$0xff]  ;;  %vm53_vm1 = vcmask 261120   ;;  %s242_s24 = smov [#allocation7]   ;;  %vm127_vm2 = vcmask 39936  }
  0x1c   :  { %153 = vmatpush3.msra.mxu0 %v45_v1  ;;  %v145_v6 = vld [vmem:[%s277_s2] ss:$0 sm:$0xff]  ;;  %s135_s25 = sshll.u32 %s242_s24, 4  ;;  %s136_s25 = int_to_ptr.vmem [resolvable:$true] %s135_s25 }
  0x1d   :  { %154 = vmatprep.subr.mxu0 %v240_v0  ;;  %s210_s26 = scalar_lea.vmem %s136_s25, 128  ;;  %p215_p11 = scmp.lt.s32.totalorder %s136_s25, %s136_s25 }
  0x1e   :  { %155 = vmatpush3.msra.mxu0 %v44_v2  ;;  %p211_p10 = scmp.ne.s32.totalorder %s136_s25, %s210_s26  ;;  %p216_p12 = scmp.lt.s32.totalorder %s210_s26, %s210_s26 }
  0x1f   :  { %156 = vmatprep.subr.mxu0 %v240_v0 }
  0x20   :  { %157 = vmatpush3.msra.mxu0 %v43_v3  ;;  %p217_p13 = por %p216_p12, %p215_p11 }
  0x21   :  { %158 = vmatprep.subr.mxu0 %v240_v0 }
  0x22   :  { %159 = vmatpush3.msra.mxu0 %v42_v4  ;;  %p218_p0 = pnand %p217_p13, %p211_p10 }
  0x23   :  { %161 = vmatmul.mubr.msk.f32.vlgmr.msra.gmra.mxu0 %vm53_vm1, %v41_v5 }
  0xe3   :  { %v123_v7 = vpop.f32.mrf.mxu0 }
  0xe4   :  { %v124_v8 = vadd.f32 %v145_v6, %v123_v7 }
  0xe5   :  { %v162_v9 = vpop.f32.mrf.mxu0 }
  0xe6   :  { %128 = vst.msk [vmem:[#allocation7] sm:$0xff] %vm127_vm2, %v124_v8 }
  0xe7   :  { %221 = shalt.err (!%p218_p0)
}
  0xe8   :  { %138 = dma.vmem_to_hbm [thread:$0]  %s136_s25, 128, %s278_s3, [#allocation4]  }
  0xe9   :  { %234 = dma.done.wait [#allocation4], 128  }
  0xea   :  { %235 = vsyncadd [#allocation4], 4294967168 }
  0xeb   :  { %142 = vsyncpa [#allocation3], 1 }
  0xec   :  { %143 = vsyncpa [#allocation6], 1 }
  0xed   :  { %144 = vsyncpa [#allocation4], 1 }

</bundles_post_ra>
